<compile_context>
chip_gen: v7x
topology: tpu7x:2x2x1
jax: 0.10.0
libtpu: 0.0.40
codegen_flags: <defaults>
</compile_context>

<pallas_src>
from functools import partial

import jax
import jax.numpy as jnp
from jax import lax
from jax.experimental import pallas as pl
from jax.experimental.pallas import tpu as pltpu

F32 = jnp.float32
BF16 = jnp.bfloat16
BN_EPS = 1e-5
LEAKY_SLOPE = 0.0                      # nn.LeakyReLU(negative_slope=0.0)

# Full-size EncoderBart configuration (identical to the PyTorch module).  The full config
# needs inputs of at least (N, C, 512, 256); the __main__ smoke test uses a reduced-depth
# variant of the same architecture so it compiles/runs quickly on one chip.
NUM_FILTERS = [32, 32, 32, 64, 64, 128, 128, 256, 256]
NUM_FILTERS_B = [32, 32, 64, 64, 128, 128, 256, 256, 1024]
VOUT_CHANNELS = 1024


# ---------------------------------------------------------------------------
# Per-generation VMEM budget / tile caps
# ---------------------------------------------------------------------------

def _vmem_capacity_bytes():
    try:
        info = pltpu.get_tpu_info()
        cap = getattr(info, "vmem_capacity_bytes", None)
        if cap:
            return int(cap)
    except Exception:
        pass
    return 64 * 1024 * 1024            # conservative default (v7x per-TC)


_VMEM_CAP = _vmem_capacity_bytes()
VMEM_LIMIT = min(96 * 1024 * 1024, (_VMEM_CAP * 3) // 4)   # 96 MiB on v5e/v6e, 48 MiB on v7x
_BIG_VMEM = _VMEM_CAP >= 100 * 1024 * 1024
ROW_TILE_CAP = 1024 if _BIG_VMEM else 512                  # BN / SE elementwise row tiles
GEMM_TM_CAP = 1024 if _BIG_VMEM else 512                   # GEMM row tiles


def _round_up(x, m):
    return ((x + m - 1) // m) * m


def _pick_row_tile(m, cap):
    """Row-tile for an (M, C) GEMM operand: prefer a tile dividing M exactly."""
    if m <= cap:
        return m, m
    for t in (1024, 512, 256, 128, 64, 32, 16, 8):
        if t <= cap and m % t == 0:
            return t, m
    return 256, _round_up(m, 256)      # rare fallback: pad M (never hit by EncoderBart)


def _row_tile(n_rows, minor, cap):
    """Largest t <= cap with n_rows % t == 0 and (t*minor) % 8 == 0, else full extent."""
    cap = max(1, min(cap, n_rows))
    if n_rows <= cap:
        return n_rows
    for t in range(cap, 0, -1):
        if n_rows % t == 0 and (t * minor) % 8 == 0:
            return t
    return n_rows


# ---------------------------------------------------------------------------
# Pallas kernels
# ---------------------------------------------------------------------------

def _gemm_kernel(a_ref, b_ref, bias_ref, o_ref, *stats_refs,
                 act, slope, with_stats, m_true, tm):
    """out = act(A @ B + bias); optional per-row-tile [sum; sum^2] stats slice (BN)."""
    r = jnp.dot(a_ref[...].astype(BF16), b_ref[...].astype(BF16),
                preferred_element_type=jnp.float32) + bias_ref[...]
    if act == "relu":
        r = jnp.maximum(r, 0.0)
    elif act == "leaky":
        r = jnp.where(r > 0, r, slope * r)
    elif act == "sigmoid":
        r = jax.nn.sigmoid(r)
    o_ref[...] = r.astype(o_ref.dtype)
    if with_stats:
        rows = pl.program_id(0) * tm + lax.broadcasted_iota(jnp.int32, (tm, 1), 0)
        rm = jnp.where(rows < m_true, r, 0.0)            # mask padded rows out of the stats
        stats_refs[0][...] = jnp.concatenate(
            [jnp.sum(rm, axis=0, keepdims=True),
             jnp.sum(rm * rm, axis=0, keepdims=True)], axis=0)


@partial(jax.jit, static_argnames=("act", "slope", "with_stats"))
def gemm(a, b, bias, act="none", slope=0.0, with_stats=False):
    """Row-tiled Pallas GEMM, bf16 MXU inputs / f32 accumulation, fused bias + activation.
    Stats (when requested) are written per row tile and reduced outside (parallel-safe)."""
    assert act == "none" or not with_stats
    m, k = a.shape
    n = b.shape[1]
    tm, mp = _pick_row_tile(m, cap=GEMM_TM_CAP)
    a = a.astype(BF16)
    if mp != m:
        a = jnp.pad(a, ((0, mp - m), (0, 0)))
    mb = mp // tm
    out_shape = [jax.ShapeDtypeStruct((mp, n), BF16)]
    out_specs = [pl.BlockSpec((tm, n), lambda i: (i, 0))]
    if with_stats:
        out_shape.append(jax.ShapeDtypeStruct((mb, 2, n), F32))
        out_specs.append(pl.BlockSpec((None, 2, n), lambda i: (i, 0, 0)))
    res = pl.pallas_call(
        partial(_gemm_kernel, act=act, slope=slope, with_stats=with_stats,
                m_true=m, tm=tm),
        out_shape=tuple(out_shape),
        grid_spec=pltpu.PrefetchScalarGridSpec(
            num_scalar_prefetch=0,
            grid=(mb,),
            in_specs=[pl.BlockSpec((tm, k), lambda i: (i, 0)),
                      pl.BlockSpec((k, n), lambda i: (0, 0)),     # resident weights
                      pl.BlockSpec((1, n), lambda i: (0, 0))],    # resident bias
            out_specs=tuple(out_specs)),
        compiler_params=pltpu.CompilerParams(
            dimension_semantics=("parallel",),
            vmem_limit_bytes=VMEM_LIMIT),
    )(a, b.astype(BF16), bias.reshape(1, n).astype(F32))
    out = res[0]
    if mp != m:
        out = out[:m]
    stats = jnp.sum(res[1], axis=0) if with_stats else None
    return out, stats


def _conv_kernel(x_ref, w_ref, b_ref, o_ref, *stats_refs,
                 kh, kw, sh, th, wout, act, slope, with_stats):
    """Fused convolution over a VMEM-resident padded sample (hp, wp, c).
    grid=(N, H_out/TH).  Per step: KH matmuls of M=TH*W_out, K=KW*Cin, one output write.
    sh==1 (overlapping row taps) or sh==kh (non-overlapping, e.g. stride-2 down convs)."""
    j = pl.program_id(1)
    c = x_ref.shape[-1]
    m2 = th * wout
    r0 = j * th * sh
    if sh == 1:
        win = x_ref[pl.ds(r0, th + kh - 1), :, :]                  # (th+kh-1, wp, c)
    else:                                                          # sh == kh
        win = x_ref[pl.ds(r0, th * kh), :, :].reshape(th, kh, x_ref.shape[1], c)
    acc = None
    for dy in range(kh):                                           # static unroll over row taps
        xr = win[dy:dy + th] if sh == 1 else win[:, dy]            # (th, wp, c)
        if kw == 1:
            patch = xr[:, :wout, :]
        else:                                                      # width im2col in VMEM
            patch = jnp.concatenate([xr[:, dx:dx + wout, :] for dx in range(kw)], axis=-1)
        part = jnp.dot(patch.reshape(m2, kw * c),
                       w_ref[dy * kw * c:(dy + 1) * kw * c, :],
                       preferred_element_type=jnp.float32)
        acc = part if acc is None else acc + part
    r = acc + b_ref[...]
    if act == "relu":
        r = jnp.maximum(r, 0.0)
    elif act == "leaky":
        r = jnp.where(r > 0, r, slope * r)
    elif act == "sigmoid":
        r = jax.nn.sigmoid(r)
    o_ref[...] = r.astype(o_ref.dtype)
    if with_stats:                                                 # per-slice stats (parallel-safe)
        stats_refs[0][...] = jnp.concatenate(
            [jnp.sum(r, axis=0, keepdims=True),
             jnp.sum(r * r, axis=0, keepdims=True)], axis=0)


@partial(jax.jit, static_argnames=("kh", "kw", "sh", "ph", "pw", "act", "slope", "with_stats"))
def conv_taps(x, w, bias, *, kh, kw, sh, ph, pw, act="none", slope=0.0, with_stats=False):
    """NHWC convolution for sh==1 (any kh/kw, sw=1) or kernel==stride (sh==kh, sw==kw, the
    width taps are folded into channels with a free reshape).  Returns (out NHWC bf16,
    stats (2, Cout) f32 | None)."""
    assert act == "none" or not with_stats
    n, h, wdim, c = x.shape
    cout = w.shape[-1]
    if sh == 1:
        if ph or pw:
            x = jnp.pad(x, ((0, 0), (ph, ph), (pw, pw), (0, 0)))
        hp, wp = h + 2 * ph, wdim + 2 * pw
        kw_k, c_k = kw, c
        wout = wp - kw + 1
        hout = hp - kh + 1
    else:
        assert sh == kh and ph == 0 and pw == 0
        wout = wdim // kw
        if wout * kw != wdim:
            x = x[:, :, :wout * kw, :]
        x = x.reshape(n, h, wout, kw * c)                 # free width->channel fold (sw == kw)
        hp, wp = h, wout
        kw_k, c_k = 1, kw * c
        hout = (h - kh) // sh + 1

    kwc = kw_k * c_k
    m_target = max(256, min(4096, (1 << 20) // (4 * max(cout, kwc))))
    th = _row_tile(hout, wout, max(1, min(256, m_target // max(wout, 1))))
    jb = hout // th

    xb = x.astype(BF16)
    w2 = w.reshape(kh * kw * c, cout).astype(BF16)
    b2 = bias.reshape(1, cout).astype(F32)

    out_shape = [jax.ShapeDtypeStruct((n, hout * wout, cout), BF16)]
    out_specs = [pl.BlockSpec((None, th * wout, cout), lambda i, j: (i, j, 0))]
    if with_stats:
        out_shape.append(jax.ShapeDtypeStruct((n, jb, 2, cout), F32))
        out_specs.append(pl.BlockSpec((None, None, 2, cout), lambda i, j: (i, j, 0, 0)))

    res = pl.pallas_call(
        partial(_conv_kernel, kh=kh, kw=kw_k, sh=sh, th=th, wout=wout,
                act=act, slope=slope, with_stats=with_stats),
        out_shape=tuple(out_shape),
        grid_spec=pltpu.PrefetchScalarGridSpec(
            num_scalar_prefetch=0,
            grid=(n, jb),
            in_specs=[
                pl.BlockSpec((None, hp, wp, c_k), lambda i, j: (i, 0, 0, 0)),  # resident sample
                pl.BlockSpec(w2.shape, lambda i, j: (0, 0)),                   # resident weights
                pl.BlockSpec((1, cout), lambda i, j: (0, 0)),                  # resident bias
            ],
            out_specs=tuple(out_specs)),
        compiler_params=pltpu.CompilerParams(
            dimension_semantics=("parallel", "parallel"),
            vmem_limit_bytes=VMEM_LIMIT),
    )(xb, w2, b2)
    out = res[0].reshape(n, hout, wout, cout)
    stats = jnp.sum(res[1], axis=(0, 1)) if with_stats else None
    return out, stats


def _bn_kernel(x_ref, sc_ref, sh_ref, *rest, has_res, slope, with_sums):
    """y = x*scale + shift (+ residual) (+ LeakyReLU); optional per-slice channel sums of y."""
    i = 0
    r_ref = None
    if has_res:
        r_ref = rest[i]
        i += 1
    o_ref = rest[i]
    i += 1
    y = x_ref[...].astype(F32) * sc_ref[...] + sh_ref[...]
    if has_res:
        y = y + r_ref[...].astype(F32)
    if slope is not None:
        y = jnp.where(y > 0, y, slope * y)
    o_ref[...] = y.astype(o_ref.dtype)
    if with_sums:
        rest[i][...] = jnp.sum(y, axis=0, keepdims=True)


@partial(jax.jit, static_argnames=("slope", "with_sums"))
def bn_apply(x, stats, gamma, beta, residual, slope, with_sums):
    """Training-mode BatchNorm2d on the conv output x (N, H*W, C) using the batch stats
    produced by the conv kernel; fused residual / LeakyReLU / SE channel sums.
    For C < 128 the lane dim is folded to ~128 for dense stores."""
    n, hw, c = x.shape
    cnt = float(n * hw)
    mean = stats[0] / cnt
    var = jnp.maximum(stats[1] / cnt - mean * mean, 0.0)   # clamp single-pass variance
    rstd = lax.rsqrt(var + BN_EPS)
    scale = gamma * rstd
    shift = beta - mean * scale

    k = 1
    if c < 128:
        k = max(1, 128 // c)
        while k > 1 and hw % k:
            k //= 2
    cf, hwf = c * k, hw // k
    xf = x.reshape(n, hwf, cf)
    scf = jnp.tile(scale, k).reshape(1, cf).astype(F32)
    shf = jnp.tile(shift, k).reshape(1, cf).astype(F32)

    has_res = residual is not None
    args = [xf, scf, shf]
    in_specs = [pl.BlockSpec((None, None, cf), lambda i, j: (i, j, 0)),
                pl.BlockSpec((1, cf), lambda i, j: (0, 0)),
                pl.BlockSpec((1, cf), lambda i, j: (0, 0))]
    thw = _row_tile(hwf, 1, ROW_TILE_CAP)
    jb = hwf // thw
    in_specs[0] = pl.BlockSpec((None, thw, cf), lambda i, j: (i, j, 0))
    if has_res:
        args.append(residual.reshape(n, hwf, cf))
        in_specs.append(pl.BlockSpec((None, thw, cf), lambda i, j: (i, j, 0)))
    out_shape = [jax.ShapeDtypeStruct((n, hwf, cf), BF16)]
    out_specs = [pl.BlockSpec((None, thw, cf), lambda i, j: (i, j, 0))]
    if with_sums:
        out_shape.append(jax.ShapeDtypeStruct((n, jb, 1, cf), F32))
        out_specs.append(pl.BlockSpec((None, None, 1, cf), lambda i, j: (i, j, 0, 0)))

    res = pl.pallas_call(
        partial(_bn_kernel, has_res=has_res, slope=slope, with_sums=with_sums),
        out_shape=tuple(out_shape),
        grid_spec=pltpu.PrefetchScalarGridSpec(
            num_scalar_prefetch=0,
            grid=(n, jb),
            in_specs=in_specs,
            out_specs=tuple(out_specs)),
        compiler_params=pltpu.CompilerParams(
            dimension_semantics=("parallel", "parallel"),
            vmem_limit_bytes=VMEM_LIMIT),
    )(*args)
    y = res[0].reshape(n, hw, c)
    sums = None
    if with_sums:
        sums = jnp.sum(res[1].reshape(n, jb, k, c), axis=(1, 2))   # (N, C)
    return y, sums


def _se_kernel(y_ref, cg_ref, w_ref, b_ref, o_ref, *, slope):
    """out = leaky_relu(max(y * channel_gate, y * sigmoid(y @ w_sse + b_sse)))."""
    y = y_ref[...].astype(F32)                                     # (THW, C)
    slog = jnp.sum(y * w_ref[...], axis=-1, keepdims=True) + b_ref[...]
    z = jnp.maximum(y * cg_ref[...].astype(F32), y * jax.nn.sigmoid(slog))
    o_ref[...] = jnp.where(z > 0, z, slope * z).astype(o_ref.dtype)


@partial(jax.jit, static_argnames=("slope",))
def se_combine(y, cgate, sse_w, sse_b, slope=0.0):
    """y: (N, H*W, C); cgate: (N, C); sse_w: (C,), sse_b: (1,).  Output bf16."""
    # TODO(synk): lane-fold for C<128 needs per-group lane reductions; kept unfolded.
    n, hw, c = y.shape
    thw = _row_tile(hw, 1, ROW_TILE_CAP)
    jb = hw // thw
    out = pl.pallas_call(
        partial(_se_kernel, slope=slope),
        out_shape=jax.ShapeDtypeStruct((n, hw, c), BF16),
        grid_spec=pltpu.PrefetchScalarGridSpec(
            num_scalar_prefetch=0,
            grid=(n, jb),
            in_specs=[pl.BlockSpec((None, thw, c), lambda i, j: (i, j, 0)),
                      pl.BlockSpec((None, 1, c), lambda i, j: (i, 0, 0)),
                      pl.BlockSpec((1, c), lambda i, j: (0, 0)),
                      pl.BlockSpec((1, 1), lambda i, j: (0, 0))],
            out_specs=pl.BlockSpec((None, thw, c), lambda i, j: (i, j, 0))),
        compiler_params=pltpu.CompilerParams(
            dimension_semantics=("parallel", "parallel"),
            vmem_limit_bytes=VMEM_LIMIT),
    )(y, cgate.reshape(n, 1, c), sse_w.reshape(1, c).astype(F32),
      sse_b.reshape(1, 1).astype(F32))
    return out


# ---------------------------------------------------------------------------
# Layer helpers (NHWC end-to-end, bf16 activations; reshape glue only)
# ---------------------------------------------------------------------------

def _conv_im2col(x, w, b, stride, padding, act, slope, with_stats):
    """Generic conv fallback (im2col + GEMM).  Used for Cin=1 (stem) and odd cases."""
    kh, kw, cin, cout = w.shape
    sh, sw = stride
    ph, pw = padding
    n, h, wdim, c = x.shape
    ho = (h + 2 * ph - kh) // sh + 1
    wo = (wdim + 2 * pw - kw) // sw + 1
    xp = jnp.pad(x, ((0, 0), (ph, ph), (pw, pw), (0, 0))) if (ph or pw) else x
    cols = [xp[:, i:i + sh * (ho - 1) + 1:sh, j:j + sw * (wo - 1) + 1:sw, :]
            for i in range(kh) for j in range(kw)]
    a = jnp.concatenate(cols, axis=-1).reshape(n * ho * wo, kh * kw * c)
    out, stats = gemm(a, w.reshape(kh * kw * c, cout), b,
                      act=act, slope=slope, with_stats=with_stats)
    return out.reshape(n, ho, wo, cout), stats


def conv2d(x, w, b, stride=(1, 1), padding=(0, 0), act="none", slope=0.0,
           with_stats=False):
    """NHWC convolution dispatcher.  w layout (KH, KW, Cin, Cout).  Returns (out, stats)."""
    if isinstance(stride, int):
        stride = (stride, stride)
    if isinstance(padding, int):
        padding = (padding, padding)
    kh, kw, cin, cout = w.shape
    sh, sw = stride
    ph, pw = padding
    n, h, wdim, c = x.shape

    # 1x1 convs (any stride, no padding): strided view + one GEMM.
    if (kh, kw) == (1, 1) and (ph, pw) == (0, 0):
        xs = x if (sh, sw) == (1, 1) else x[:, ::sh, ::sw, :]
        nb, ho, wo, _ = xs.shape
        out, stats = gemm(xs.reshape(nb * ho * wo, c), w.reshape(c, cout), b,
                          act=act, slope=slope, with_stats=with_stats)
        return out.reshape(nb, ho, wo, cout), stats

    # Tiny-Cin convs (stem, Cin=1): im2col GEMM with K = KH*KW*Cin.
    if cin * kh * kw <= 32:
        return _conv_im2col(x, w, b, stride, padding, act, slope, with_stats)

    # Guard: the fused conv keeps one padded sample resident in VMEM.
    resident_bytes = (h + 2 * ph) * (wdim + 2 * pw) * c * 2
    if resident_bytes <= VMEM_LIMIT // 3:
        if (sh, sw) == (1, 1):
            return conv_taps(x, w, b, kh=kh, kw=kw, sh=1, ph=ph, pw=pw,
                             act=act, slope=slope, with_stats=with_stats)
        if (sh, sw) == (kh, kw) and (ph, pw) == (0, 0):
            return conv_taps(x, w, b, kh=kh, kw=kw, sh=sh, ph=0, pw=0,
                             act=act, slope=slope, with_stats=with_stats)

    # TODO(synk): generic strided fallback / oversize samples still use im2col.
    return _conv_im2col(x, w, b, stride, padding, act, slope, with_stats)


def _bn_block(x, stats, bn_p, residual, slope, want_sums):
    n, h, w, c = x.shape
    rr = None if residual is None else residual.reshape(n, h * w, c)
    y, sums = bn_apply(x.reshape(n, h * w, c), stats, bn_p["gamma"], bn_p["beta"], rr,
                       slope=slope, with_sums=want_sums)
    return y.reshape(n, h, w, c), sums


def basic_block(p, x, slope=LEAKY_SLOPE):
    """components2D BasicBlock (NHWC): conv-bn-act-conv-bn, always-on conv residual,
    concurrent channel/spatial SE, trailing LeakyReLU."""
    stride, padding = p["stride"], p["padding"]
    # residual is ALWAYS downsample_func(x): `downsample` is a bool, never None in PyTorch.
    res, _ = conv2d(x, p["ds"]["w"], p["ds"]["b"], stride=stride, padding=padding)
    h, st1 = conv2d(x, p["conv1"]["w"], p["conv1"]["b"], stride=stride, padding=padding,
                    with_stats=True)
    h, _ = _bn_block(h, st1, p["bn1"], residual=None, slope=slope, want_sums=False)
    h, st2 = conv2d(h, p["conv2"]["w"], p["conv2"]["b"], stride=1, padding=padding,
                    with_stats=True)
    y, ysums = _bn_block(h, st2, p["bn2"], residual=res, slope=None, want_sums=True)
    n, hh, ww, c = y.shape
    # channel SE (reduction_ratio=1), batched over N; squeeze mean comes from the BN kernel.
    sq = ysums / float(hh * ww)
    h1, _ = gemm(sq, p["cse_fc1"]["w"], p["cse_fc1"]["b"], act="relu")
    cg, _ = gemm(h1, p["cse_fc2"]["w"], p["cse_fc2"]["b"], act="sigmoid")
    # spatial SE + channel/spatial gate max + LeakyReLU fused in one kernel.
    out = se_combine(y.reshape(n, hh * ww, c), cg, p["sse"]["w"], p["sse"]["b"],
                     slope=slope)
    return out.reshape(n, hh, ww, c)


# ---------------------------------------------------------------------------
# Deterministic parameter construction (shapes dictated by EncoderBart.__init__)
# ---------------------------------------------------------------------------

def _conv_init(key, cin, cout, kh, kw):
    kw_, kb = jax.random.split(key)
    fan_in = cin * kh * kw
    w = (jax.random.normal(kw_, (kh, kw, cin, cout), F32) / (fan_in ** 0.5)).astype(BF16)
    b = 0.01 * jax.random.normal(kb, (cout,), F32)
    return {"w": w, "b": b}


def _linear_init(key, fin, fout):
    kw_, kb = jax.random.split(key)
    w = (jax.random.normal(kw_, (fin, fout), F32) / (fin ** 0.5)).astype(BF16)
    b = 0.01 * jax.random.normal(kb, (fout,), F32)
    return {"w": w, "b": b}


def _bn_init(c):
    return {"gamma": jnp.ones((c,), F32), "beta": jnp.zeros((c,), F32)}


def _basic_block_init(key, cin, cout, k, padding):
    ks = jax.random.split(key, 7)
    return {
        "stride": (1, 1),
        "padding": (padding, padding),
        "conv1": _conv_init(ks[0], cin, cout, k, k),
        "bn1": _bn_init(cout),
        "conv2": _conv_init(ks[1], cout, cout, k, k),
        "bn2": _bn_init(cout),
        "ds": _conv_init(ks[2], cin, cout, k, k),              # downsample_func
        "cse_fc1": _linear_init(ks[3], cout, cout),            # reduction_ratio = 1
        "cse_fc2": _linear_init(ks[4], cout, cout),
        "sse": {"w": jax.random.normal(ks[5], (cout,), F32) / (cout ** 0.5),
                "b": 0.01 * jax.random.normal(ks[6], (1,), F32)},
    }


class EncoderBartPallas:
    """EncoderBart forward with Pallas TPU kernels.  NCHW in / NCHW out at the boundary,
    NHWC bf16 internally.  Default config matches the PyTorch module exactly (requires
    inputs of at least (N, C, 512, 256))."""

    def __init__(self, key, in_channels=1, num_filters=None, num_filters_b=None,
                 vout_channels=VOUT_CHANNELS):
        nf = list(NUM_FILTERS if num_filters is None else num_filters)
        nfb = list(NUM_FILTERS_B if num_filters_b is None else num_filters_b)
        self.nf, self.nfb, self.vout_channels = nf, nfb, vout_channels
        kit = iter(jax.random.split(key, 1024))
        # downPathVertical[0] == self.conv: Conv3x3(pad1) -> LeakyReLU(0.0) -> BasicBlock
        self.stem_conv = _conv_init(next(kit), in_channels, nf[0], 3, 3)
        self.stem_bb = _basic_block_init(next(kit), nf[0], nf[1], 3, 1)
        # downPathVertical[1..]: Conv2x2 stride2 -> BasicBlock
        self.down = []
        for i in range(len(nf) - 1):
            self.down.append({
                "conv": _conv_init(next(kit), nf[i], nf[i + 1], 2, 2),
                "bb": _basic_block_init(next(kit), nf[i + 1], nf[i + 1], 3, 1),
            })
        # downPathVerticalOut: Conv1x1 stride2 -> BasicBlock(k=1, p=0) x2
        self.vout_conv = _conv_init(next(kit), nf[-1], vout_channels, 1, 1)
        self.vout_bb = [_basic_block_init(next(kit), vout_channels, vout_channels, 1, 0)
                        for _ in range(2)]
        # pathHorizontal[idx-1], idx = 1..len(nf)
        self.horiz = []
        for idx in range(1, len(nf) + 1):
            steps = []
            for i in range(idx - 1, len(nf) - 1):
                steps.append({
                    "conv": _conv_init(next(kit), nf[i], nf[i + 1], 2, 1),
                    "bb": _basic_block_init(next(kit), nf[i + 1], nf[i + 1], 3, 1),
                })
            self.horiz.append({
                "steps": steps,
                "final": _conv_init(next(kit), nf[-1], nfb[idx - 1], 2, 1),
            })

    def __call__(self, x_nchw):
        x = jnp.transpose(x_nchw.astype(F32), (0, 2, 3, 1))     # NCHW -> NHWC once
        slope = LEAKY_SLOPE
        acts = []                                               # forward-hook stand-ins
        h, _ = conv2d(x, self.stem_conv["w"], self.stem_conv["b"], stride=1, padding=1,
                      act="leaky", slope=slope)
        h = basic_block(self.stem_bb, h, slope=slope)
        acts.append(h)
        for blk in self.down:
            h, _ = conv2d(h, blk["conv"]["w"], blk["conv"]["b"], stride=2, padding=0)
            h = basic_block(blk["bb"], h, slope=slope)
            acts.append(h)
        # vertical output head
        v, _ = conv2d(h, self.vout_conv["w"], self.vout_conv["b"], stride=2, padding=0)
        for bbp in self.vout_bb:
            v = basic_block(bbp, v, slope=slope)
        # horizontal paths applied to the hooked activations
        out_h = []
        for i, path in enumerate(self.horiz):
            t = acts[i]
            for st in path["steps"]:
                t, _ = conv2d(t, st["conv"]["w"], st["conv"]["b"],
                              stride=(2, 1), padding=0)
                t = basic_block(st["bb"], t, slope=slope)
            t, _ = conv2d(t, path["final"]["w"], path["final"]["b"],
                          stride=1, padding=0)
            out_h.append(jnp.transpose(t.astype(F32), (0, 3, 1, 2)))   # back to NCHW f32
        return jnp.transpose(v.astype(F32), (0, 3, 1, 2)), out_h


if __name__ == "__main__":
    key = jax.random.PRNGKey(0)
    pkey, xkey = jax.random.split(key)
    # Reduced-depth smoke-test configuration.  The full 9-stage EncoderBart requires inputs
    # of at least (1, 1, 512, 256) and ~50 BasicBlocks (hundreds of kernel compilations);
    # this 4-stage variant exercises every layer type (stem, stride-2 down convs, (2,1)
    # horizontal convs, 1x1 vertical-out blocks, BN, SE) at small shapes.
    nf_small = [8, 8, 8, 16]
    nfb_small = [8, 8, 16, 32]
    model = EncoderBartPallas(pkey, in_channels=1, num_filters=nf_small,
                              num_filters_b=nfb_small, vout_channels=32)
    x = jax.random.normal(xkey, (2, 1, 16, 8), F32)
    out_v, out_h = model(x)
    jax.block_until_ready(out_v)
    for t in out_h:
        jax.block_until_ready(t)
    assert out_v.shape == (2, 32, 1, 1), out_v.shape
    assert len(out_h) == len(nf_small), len(out_h)
    assert out_h[0].shape == (2, nfb_small[0], 1, 8), out_h[0].shape
    assert out_h[-1].shape == (2, 32, 1, 1), out_h[-1].shape
    assert bool(jnp.all(jnp.isfinite(out_v)))
    print("KERNEL_OK")
</pallas_src>

<mosaic_0001>
module attributes {stable_mosaic.version = 11 : i64} {
  func.func @_gemm_kernel(%arg0: i32, %arg1: memref<256x9xbf16, #tpu.memory_space<vmem>>, %arg2: memref<9x8xbf16, #tpu.memory_space<vmem>>, %arg3: memref<1x8xf32, #tpu.memory_space<vmem>>, %arg4: memref<256x8xbf16, #tpu.memory_space<vmem>>) attributes {dimension_semantics = [#tpu.dimension_semantics<parallel>], iteration_bounds = array<i64: 1>, scalar_prefetch = 0 : i64, scratch_operands = 0 : i64, tpu.core_type = #tpu.core_type<tc>, window_params = [{transform_indices = @transform_0, window_bounds = array<i64: 256, 9>}, {pipeline_mode = #tpu.pipeline_mode<synchronous>, transform_indices = @transform_1, window_bounds = array<i64: 9, 8>}, {pipeline_mode = #tpu.pipeline_mode<synchronous>, transform_indices = @transform_2, window_bounds = array<i64: 1, 8>}, {transform_indices = @transform_3, window_bounds = array<i64: 256, 8>}]} {
    %c0 = arith.constant 0 : index
    %c0_0 = arith.constant 0 : index
    %0 = vector.load %arg1[%c0, %c0_0] : memref<256x9xbf16, #tpu.memory_space<vmem>>, vector<256x9xbf16>
    %c0_1 = arith.constant 0 : index
    %c0_2 = arith.constant 0 : index
    %1 = vector.load %arg2[%c0_1, %c0_2] : memref<9x8xbf16, #tpu.memory_space<vmem>>, vector<9x8xbf16>
    %cst = arith.constant dense<0.000000e+00> : vector<256x8xf32>
    %2 = tpu.matmul %0, %1, %cst {dimension_numbers = #tpu.dot_dimension_numbers<[1], [0], [0], [1], [0, 0, 1, 1], [], []>} : vector<256x9xbf16>, vector<9x8xbf16>, vector<256x8xf32> -> vector<256x8xf32>
    %c0_3 = arith.constant 0 : index
    %c0_4 = arith.constant 0 : index
    %3 = vector.load %arg3[%c0_3, %c0_4] : memref<1x8xf32, #tpu.memory_space<vmem>>, vector<1x8xf32>
    %4 = vector.broadcast %3 : vector<1x8xf32> to vector<256x8xf32>
    %5 = arith.addf %2, %4 : vector<256x8xf32>
    %cst_5 = arith.constant 0.000000e+00 : f32
    %6 = vector.broadcast %cst_5 : f32 to vector<256x8xf32>
    %7 = arith.cmpf ogt, %5, %6 : vector<256x8xf32>
    %cst_6 = arith.constant 0.000000e+00 : f32
    %8 = vector.broadcast %cst_6 : f32 to vector<256x8xf32>
    %9 = arith.mulf %8, %5 : vector<256x8xf32>
    %10 = arith.select %7, %5, %9 : vector<256x8xi1>, vector<256x8xf32>
    %11 = arith.truncf %10 : vector<256x8xf32> to vector<256x8xbf16>
    %c0_7 = arith.constant 0 : index
    %c0_8 = arith.constant 0 : index
    %12 = vector.load %arg4[%c0_7, %c0_8] : memref<256x8xbf16, #tpu.memory_space<vmem>>, vector<256x8xbf16>
    tpu.vector_store %arg4[%c0_7, %c0_8], %11 {strides = array<i32>} : memref<256x8xbf16, #tpu.memory_space<vmem>>, vector<256x8xbf16>,
    return
  }
  func.func @transform_0(%arg0: i32) -> (i32, i32) {
    %c0_i32 = arith.constant 0 : i32
    %c0_i32_0 = arith.constant 0 : i32
    return %arg0, %c0_i32 : i32, i32
  }
  func.func @transform_1(%arg0: i32) -> (i32, i32) {
    %c0_i32 = arith.constant 0 : i32
    %c0_i32_0 = arith.constant 0 : i32
    %c0_i32_1 = arith.constant 0 : i32
    return %c0_i32, %c0_i32_0 : i32, i32
  }
  func.func @transform_2(%arg0: i32) -> (i32, i32) {
    %c0_i32 = arith.constant 0 : i32
    %c0_i32_0 = arith.constant 0 : i32
    %c0_i32_1 = arith.constant 0 : i32
    return %c0_i32, %c0_i32_0 : i32, i32
  }
  func.func @transform_3(%arg0: i32) -> (i32, i32) {
    %c0_i32 = arith.constant 0 : i32
    %c0_i32_0 = arith.constant 0 : i32
    return %arg0, %c0_i32 : i32, i32
  }
}

</mosaic_0001>

<bundles_post_ra>
// kernel: gemm.1
= control target key start
LH: loop header
LB: loop body
LE: loop exit
PB: predicated region body
PF: predicated region fallthrough
CT: control target
= control target key end

     0   :  { %vm190_vm0 = vcmask 1043456   ;;  %vm191_vm1 = vcmask 1044480   ;;  %vm141_vm2 = vcmask 72704   ;;  %v788_v1 = vmov 65535   ;;  %s1042_s1 = inlined_call_operand.vmem [shape: bf16[9,8], index: 1, kind: input, shape index: {}]   ;;  %s1043_s0 = inlined_call_operand.vmem [shape: bf16[256,9], index: 0, kind: input, shape index: {}]   ;;  %s1044_s2 = inlined_call_operand.vmem [shape: f32[1,8], index: 2, kind: input, shape index: {}]   ;;  %s1045_s3 = inlined_call_operand.vmem [shape: bf16[256,8], index: 3, kind: output, shape index: {}]  }
   0x1   :  { %v771_v0 = vld [vmem:[%s1042_s1] sm:$0x1f]   ;;  %v192_v2 = vsel %vm190_vm0, 4294967295, %v788_v1  ;;  %v774_v7 = vld [vmem:[%s1043_s0 + $0x8] sm:$0xff]   ;;  %v776_v9 = vld [vmem:[%s1043_s0 + $0x10] sm:$0xff]   ;;  %vm582_vm3 = vcmask 60416  }
   0x2   :  { %v772_v3 = vld [vmem:[%s1043_s0] sm:$0xff]   ;;  %v193_v4 = vsel %vm191_vm1, %v192_v2, 0  ;;  %v775_v8 = vld [vmem:[%s1043_s0 + $0x48] sm:$0xff]   ;;  %v777_v10 = vld [vmem:[%s1043_s0 + $0x50] sm:$0xff]  }
   0x3   :  { %v773_v5 = vld [vmem:[%s1043_s0 + $0x40] sm:$0xff]   ;;  %v195_v6 = vand.u32 %v771_v0, %v193_v4  ;;  %736 = vmatprep.mubr.msk.bf16.mxu0 %vm141_vm2, %v772_v3  ;;  %v778_v11 = vld [vmem:[%s1043_s0 + $0x18] sm:$0xff]   ;;  %v782_v15 = vld [vmem:[%s1043_s0 + $0x28] sm:$0xff]  }
   0x4   :  { %752 = vmatprep.mubr.msk.bf16.mxu1 %vm141_vm2, %v773_v5  ;;  %v779_v12 = vld [vmem:[%s1043_s0 + $0x58] sm:$0xff]   ;;  %v780_v13 = vld [vmem:[%s1043_s0 + $0x20] sm:$0xff]   ;;  %v783_v16 = vld [vmem:[%s1043_s0 + $0x68] sm:$0xff]  }
   0x5   :  { %734 = vmatprep.subr.bf16.mxu0 %v195_v6  ;;  %768 = vmatprep.subr.bf16.mxu1 %v195_v6  ;;  %v781_v14 = vld [vmem:[%s1043_s0 + $0x60] sm:$0xff]   ;;  %v784_v17 = vld [vmem:[%s1043_s0 + $0x30] sm:$0xff]   ;;  %v786_v19 = vld [vmem:[%s1043_s0 + $0x38] sm:$0xff]  }
   0x6   :  { %735 = vmatpush3.bf16.msra.mxu0 %v195_v6  ;;  %769 = vmatpush3.bf16.msra.mxu1 %v195_v6  ;;  %v785_v18 = vld [vmem:[%s1043_s0 + $0x70] sm:$0xff]   ;;  %v787_v20 = vld [vmem:[%s1043_s0 + $0x78] sm:$0xff]   ;;  %v879_v21 = vld [vmem:[%s1044_s2] ss:$0 sm:$0xff] }
   0x9   :  { %737 = vmatmul.mubr.msk.bf16.vlgmr.msra.gmra.mrb[0].mxu0 %vm141_vm2, %v774_v7  ;;  %753 = vmatmul.mubr.msk.bf16.vlgmr.msra.gmra.mrb[0].mxu1 %vm141_vm2, %v775_v8 }
   0xa   :  { %740 = vmatprep.mubr.msk.bf16.mxu0 %vm141_vm2, %v776_v9  ;;  %756 = vmatprep.mubr.msk.bf16.mxu1 %vm141_vm2, %v777_v10 }
  0x11   :  { %741 = vmatmul.mubr.msk.bf16.gmra.mrb[4].mxu0 %vm141_vm2, %v778_v11  ;;  %757 = vmatmul.mubr.msk.bf16.gmra.mrb[4].mxu1 %vm141_vm2, %v779_v12 }
  0x12   :  { %744 = vmatprep.mubr.msk.bf16.mxu0 %vm141_vm2, %v780_v13  ;;  %760 = vmatprep.mubr.msk.bf16.mxu1 %vm141_vm2, %v781_v14 }
  0x19   :  { %745 = vmatmul.mubr.msk.bf16.gmra.mrb[8].mxu0 %vm141_vm2, %v782_v15  ;;  %761 = vmatmul.mubr.msk.bf16.gmra.mrb[8].mxu1 %vm141_vm2, %v783_v16 }
  0x1a   :  { %748 = vmatprep.mubr.msk.bf16.mxu0 %vm141_vm2, %v784_v17  ;;  %764 = vmatprep.mubr.msk.bf16.mxu1 %vm141_vm2, %v785_v18 }
  0x21   :  { %749 = vmatmul.mubr.msk.bf16.gmra.mrb[12].mxu0 %vm141_vm2, %v786_v19  ;;  %765 = vmatmul.mubr.msk.bf16.gmra.mrb[12].mxu1 %vm141_vm2, %v787_v20 }
  0xdc   :  { %v738_v22 = vpop.f32.mrb[0].mxu0  ;;  %v754_v23 = vpop.f32.mrb[0].mxu1 }
  0xdd   :  { %v240_v24 = vadd.f32 %v738_v22, %v879_v21  ;;  %v304_v25 = vadd.f32 %v754_v23, %v879_v21  ;;  %v231_v26 = vpop.f32.mrb[1].mxu0  ;;  %v295_v27 = vpop.f32.mrb[1].mxu1 }
  0xde   :  { %v232_v28 = vadd.f32 %v879_v21, %v231_v26  ;;  %v296_v29 = vadd.f32 %v879_v21, %v295_v27  ;;  %v739_v30 = vpop.f32.mrb[2].mxu0  ;;  %v755_v31 = vpop.f32.mrb[2].mxu1 }
  0xdf   :  { %vm360_vm4 = vcmp.gt.f32.partialorder %v240_v24, 0.0  ;;  %v392_v32 = vmul.f32 0.0, %v240_v24  ;;  %vm376_vm5 = vcmp.gt.f32.partialorder %v304_v25, 0.0  ;;  %v408_v33 = vmul.f32 0.0, %v304_v25  ;;  %v234_v34 = vpop.f32.mrb[3].mxu0  ;;  %v298_v35 = vpop.f32.mrb[3].mxu1 }
  0xe0   :  { %vm358_vm6 = vcmp.gt.f32.partialorder %v232_v28, 0.0  ;;  %v390_v36 = vmul.f32 0.0, %v232_v28  ;;  %vm374_vm7 = vcmp.gt.f32.partialorder %v296_v29, 0.0  ;;  %v406_v37 = vmul.f32 0.0, %v296_v29 }
  0xe1   :  { %v424_v38 = vsel %vm360_vm4, %v240_v24, %v392_v32  ;;  %v440_v39 = vsel %vm376_vm5, %v304_v25, %v408_v33  ;;  %v243_v40 = vadd.f32 %v739_v30, %v879_v21  ;;  %v307_v41 = vadd.f32 %v755_v31, %v879_v21 }
  0xe2   :  { %v687_v42 = vpack.c.bf16 %v424_v38, %v424_v38  ;;  %v703_v43 = vpack.c.bf16 %v440_v39, %v440_v39  ;;  %v422_v44 = vsel %vm358_vm6, %v232_v28, %v390_v36  ;;  %v438_v45 = vsel %vm374_vm7, %v296_v29, %v406_v37 }
  0xe3   :  { %v685_v46 = vpack.c.bf16 %v422_v44, %v422_v44  ;;  %v701_v47 = vpack.c.bf16 %v438_v45, %v438_v45  ;;  %vm361_vm8 = vcmp.gt.f32.partialorder %v243_v40, 0.0  ;;  %v393_v48 = vmul.f32 0.0, %v243_v40 }
  0xe4   :  { %585 = vst.msk [vmem:[%s1045_s3 + $0x8] sm:$0xf] %vm582_vm3, %v687_v42  ;;  %601 = vst.msk [vmem:[%s1045_s3 + $0x48] sm:$0xf] %vm582_vm3, %v703_v43  ;;  %vm377_vm9 = vcmp.gt.f32.partialorder %v307_v41, 0.0  ;;  %v409_v49 = vmul.f32 0.0, %v307_v41  ;;  %v235_v50 = vadd.f32 %v879_v21, %v234_v34  ;;  %v299_v51 = vadd.f32 %v879_v21, %v298_v35 }
  0xe5   :  { %v742_v52 = vpop.f32.mrb[4].mxu0  ;;  %v758_v53 = vpop.f32.mrb[4].mxu1  ;;  %583 = vst.msk [vmem:[%s1045_s3] sm:$0xf] %vm582_vm3, %v685_v46  ;;  %599 = vst.msk [vmem:[%s1045_s3 + $0x40] sm:$0xf] %vm582_vm3, %v701_v47  ;;  %v425_v54 = vsel %vm361_vm8, %v243_v40, %v393_v48 }
  0xe6   :  { %v256_v55 = vadd.f32 %v742_v52, %v879_v21  ;;  %v320_v56 = vadd.f32 %v758_v53, %v879_v21  ;;  %v247_v57 = vpop.f32.mrb[5].mxu0  ;;  %v311_v58 = vpop.f32.mrb[5].mxu1  ;;  %v688_v59 = vpack.c.bf16 %v425_v54, %v425_v54  ;;  %v441_v60 = vsel %vm377_vm9, %v307_v41, %v409_v49 }
  0xe7   :  { %vm359_vm10 = vcmp.gt.f32.partialorder %v235_v50, 0.0  ;;  %v391_v61 = vmul.f32 0.0, %v235_v50  ;;  %v743_v62 = vpop.f32.mrb[6].mxu0  ;;  %v759_v63 = vpop.f32.mrb[6].mxu1  ;;  %v704_v0 = vpack.c.bf16 %v441_v60, %v441_v60  ;;  %vm375_vm11 = vcmp.gt.f32.partialorder %v299_v51, 0.0 }
  0xe8   :  { %v407_v1 = vmul.f32 0.0, %v299_v51  ;;  %vm364_vm12 = vcmp.gt.f32.partialorder %v256_v55, 0.0  ;;  %v250_v2 = vpop.f32.mrb[7].mxu0  ;;  %v314_v3 = vpop.f32.mrb[7].mxu1  ;;  %586 = vst.msk [vmem:[%s1045_s3 + $0xc] sm:$0xf] %vm582_vm3, %v688_v59  ;;  %v248_v9 = vadd.f32 %v879_v21, %v247_v57  ;;  %v312_v10 = vadd.f32 %v879_v21, %v311_v58 }
  0xe9   :  { %v423_v4 = vsel %vm359_vm10, %v235_v50, %v391_v61  ;;  %v396_v5 = vmul.f32 0.0, %v256_v55  ;;  %vm380_vm13 = vcmp.gt.f32.partialorder %v320_v56, 0.0  ;;  %v412_v6 = vmul.f32 0.0, %v320_v56  ;;  %602 = vst.msk [vmem:[%s1045_s3 + $0x4c] sm:$0xf] %vm582_vm3, %v704_v0 }
  0xea   :  { %v686_v7 = vpack.c.bf16 %v423_v4, %v423_v4  ;;  %v439_v8 = vsel %vm375_vm11, %v299_v51, %v407_v1  ;;  %v259_v14 = vadd.f32 %v743_v62, %v879_v21  ;;  %vm362_vm14 = vcmp.gt.f32.partialorder %v248_v9, 0.0 }
  0xeb   :  { %v702_v11 = vpack.c.bf16 %v439_v8, %v439_v8  ;;  %v428_v12 = vsel %vm364_vm12, %v256_v55, %v396_v5  ;;  %v444_v13 = vsel %vm380_vm13, %v320_v56, %v412_v6  ;;  %v394_v17 = vmul.f32 0.0, %v248_v9 }
  0xec   :  { %584 = vst.msk [vmem:[%s1045_s3 + $0x4] sm:$0xf] %vm582_vm3, %v686_v7  ;;  %v691_v15 = vpack.c.bf16 %v428_v12, %v428_v12  ;;  %v707_v16 = vpack.c.bf16 %v444_v13, %v444_v13  ;;  %vm378_vm15 = vcmp.gt.f32.partialorder %v312_v10, 0.0  ;;  %v410_v18 = vmul.f32 0.0, %v312_v10  ;;  %v746_v20 = vpop.f32.mrb[8].mxu0  ;;  %v762_v22 = vpop.f32.mrb[8].mxu1 }
  0xed   :  { %600 = vst.msk [vmem:[%s1045_s3 + $0x44] sm:$0xf] %vm582_vm3, %v702_v11  ;;  %vm365_vm0 = vcmp.gt.f32.partialorder %v259_v14, 0.0  ;;  %v397_v19 = vmul.f32 0.0, %v259_v14  ;;  %v426_v23 = vsel %vm362_vm14, %v248_v9, %v394_v17  ;;  %v323_v24 = vadd.f32 %v759_v63, %v879_v21  ;;  %v263_v27 = vpop.f32.mrb[9].mxu0  ;;  %v327_v28 = vpop.f32.mrb[9].mxu1 }
  0xee   :  { %589 = vst.msk [vmem:[%s1045_s3 + $0x18] sm:$0xf] %vm582_vm3, %v691_v15  ;;  %605 = vst.msk [vmem:[%s1045_s3 + $0x58] sm:$0xf] %vm582_vm3, %v707_v16  ;;  %v251_v25 = vadd.f32 %v879_v21, %v250_v2  ;;  %v315_v26 = vadd.f32 %v879_v21, %v314_v3  ;;  %v689_v29 = vpack.c.bf16 %v426_v23, %v426_v23  ;;  %v747_v33 = vpop.f32.mrb[10].mxu0  ;;  %v763_v34 = vpop.f32.mrb[10].mxu1 }
  0xef   :  { %v442_v30 = vsel %vm378_vm15, %v312_v10, %v410_v18  ;;  %v429_v31 = vsel %vm365_vm0, %v259_v14, %v397_v19  ;;  %v272_v32 = vadd.f32 %v746_v20, %v879_v21  ;;  %vm381_vm1 = vcmp.gt.f32.partialorder %v323_v24, 0.0  ;;  %v266_v38 = vpop.f32.mrb[11].mxu0  ;;  %v330_v39 = vpop.f32.mrb[11].mxu1 }
  0xf0   :  { %v705_v35 = vpack.c.bf16 %v442_v30, %v442_v30  ;;  %v692_v36 = vpack.c.bf16 %v429_v31, %v429_v31  ;;  %v413_v37 = vmul.f32 0.0, %v323_v24  ;;  %587 = vst.msk [vmem:[%s1045_s3 + $0x10] sm:$0xf] %vm582_vm3, %v689_v29  ;;  %vm363_vm2 = vcmp.gt.f32.partialorder %v251_v25, 0.0 }
  0xf1   :  { %v395_v40 = vmul.f32 0.0, %v251_v25  ;;  %vm379_vm4 = vcmp.gt.f32.partialorder %v315_v26, 0.0  ;;  %v411_v41 = vmul.f32 0.0, %v315_v26  ;;  %vm368_vm5 = vcmp.gt.f32.partialorder %v272_v32, 0.0 }
  0xf2   :  { %603 = vst.msk [vmem:[%s1045_s3 + $0x50] sm:$0xf] %vm582_vm3, %v705_v35  ;;  %590 = vst.msk [vmem:[%s1045_s3 + $0x1c] sm:$0xf] %vm582_vm3, %v692_v36  ;;  %v445_v42 = vsel %vm381_vm1, %v323_v24, %v413_v37  ;;  %v400_v43 = vmul.f32 0.0, %v272_v32  ;;  %v336_v44 = vadd.f32 %v762_v22, %v879_v21  ;;  %v264_v48 = vadd.f32 %v879_v21, %v263_v27 }
  0xf3   :  { %v708_v45 = vpack.c.bf16 %v445_v42, %v445_v42  ;;  %v427_v46 = vsel %vm363_vm2, %v251_v25, %v395_v40  ;;  %v443_v47 = vsel %vm379_vm4, %v315_v26, %v411_v41  ;;  %v328_v57 = vadd.f32 %v879_v21, %v327_v28 }
  0xf4   :  { %v690_v49 = vpack.c.bf16 %v427_v46, %v427_v46  ;;  %v706_v50 = vpack.c.bf16 %v443_v47, %v443_v47  ;;  %v432_v51 = vsel %vm368_vm5, %v272_v32, %v400_v43  ;;  %vm384_vm6 = vcmp.gt.f32.partialorder %v336_v44, 0.0  ;;  %v750_v55 = vpop.f32.mrb[12].mxu0  ;;  %v766_v56 = vpop.f32.mrb[12].mxu1 }
  0xf5   :  { %606 = vst.msk [vmem:[%s1045_s3 + $0x5c] sm:$0xf] %vm582_vm3, %v708_v45  ;;  %v695_v52 = vpack.c.bf16 %v432_v51, %v432_v51  ;;  %v416_v53 = vmul.f32 0.0, %v336_v44  ;;  %vm366_vm7 = vcmp.gt.f32.partialorder %v264_v48, 0.0  ;;  %v398_v54 = vmul.f32 0.0, %v264_v48  ;;  %v279_v61 = vpop.f32.mrb[13].mxu0 }
  0xf6   :  { %588 = vst.msk [vmem:[%s1045_s3 + $0x14] sm:$0xf] %vm582_vm3, %v690_v49  ;;  %604 = vst.msk [vmem:[%s1045_s3 + $0x54] sm:$0xf] %vm582_vm3, %v706_v50  ;;  %v275_v58 = vadd.f32 %v747_v33, %v879_v21  ;;  %v339_v59 = vadd.f32 %v763_v34, %v879_v21  ;;  %v267_v60 = vadd.f32 %v879_v21, %v266_v38  ;;  %v343_v62 = vpop.f32.mrb[13].mxu1  ;;  %v751_v3 = vpop.f32.mrb[14].mxu0 }
  0xf7   :  { %593 = vst.msk [vmem:[%s1045_s3 + $0x28] sm:$0xf] %vm582_vm3, %v695_v52  ;;  %v448_v63 = vsel %vm384_vm6, %v336_v44, %v416_v53  ;;  %v430_v0 = vsel %vm366_vm7, %v264_v48, %v398_v54  ;;  %v331_v1 = vadd.f32 %v879_v21, %v330_v39  ;;  %v288_v2 = vadd.f32 %v750_v55, %v879_v21  ;;  %v767_v4 = vpop.f32.mrb[14].mxu1  ;;  %v282_v8 = vpop.f32.mrb[15].mxu0 }
  0xf8   :  { %v711_v5 = vpack.c.bf16 %v448_v63, %v448_v63  ;;  %v693_v6 = vpack.c.bf16 %v430_v0, %v430_v0  ;;  %vm382_vm8 = vcmp.gt.f32.partialorder %v328_v57, 0.0  ;;  %v414_v7 = vmul.f32 0.0, %v328_v57  ;;  %v346_v9 = vpop.f32.mrb[15].mxu1 }
  0xf9   :  { %vm369_vm9 = vcmp.gt.f32.partialorder %v275_v58, 0.0  ;;  %v401_v10 = vmul.f32 0.0, %v275_v58  ;;  %vm385_vm10 = vcmp.gt.f32.partialorder %v339_v59, 0.0  ;;  %v417_v11 = vmul.f32 0.0, %v339_v59 }
  0xfa   :  { %609 = vst.msk [vmem:[%s1045_s3 + $0x68] sm:$0xf] %vm582_vm3, %v711_v5  ;;  %591 = vst.msk [vmem:[%s1045_s3 + $0x20] sm:$0xf] %vm582_vm3, %v693_v6  ;;  %v446_v12 = vsel %vm382_vm8, %v328_v57, %v414_v7  ;;  %vm367_vm11 = vcmp.gt.f32.partialorder %v267_v60, 0.0  ;;  %v399_v13 = vmul.f32 0.0, %v267_v60  ;;  %v352_v25 = vadd.f32 %v766_v56, %v879_v21 }
  0xfb   :  { %vm383_vm12 = vcmp.gt.f32.partialorder %v331_v1, 0.0  ;;  %v709_v14 = vpack.c.bf16 %v446_v12, %v446_v12  ;;  %v433_v15 = vsel %vm369_vm9, %v275_v58, %v401_v10  ;;  %v449_v16 = vsel %vm385_vm10, %v339_v59, %v417_v11 }
  0xfc   :  { %v415_v17 = vmul.f32 0.0, %v331_v1  ;;  %v696_v18 = vpack.c.bf16 %v433_v15, %v433_v15  ;;  %v712_v19 = vpack.c.bf16 %v449_v16, %v449_v16  ;;  %v431_v20 = vsel %vm367_vm11, %v267_v60, %v399_v13 }
  0xfd   :  { %vm372_vm13 = vcmp.gt.f32.partialorder %v288_v2, 0.0  ;;  %607 = vst.msk [vmem:[%s1045_s3 + $0x60] sm:$0xf] %vm582_vm3, %v709_v14  ;;  %v694_v22 = vpack.c.bf16 %v431_v20, %v431_v20  ;;  %v404_v24 = vmul.f32 0.0, %v288_v2  ;;  %v280_v27 = vadd.f32 %v879_v21, %v279_v61 }
  0xfe   :  { %v447_v23 = vsel %vm383_vm12, %v331_v1, %v415_v17  ;;  %594 = vst.msk [vmem:[%s1045_s3 + $0x2c] sm:$0xf] %vm582_vm3, %v696_v18  ;;  %610 = vst.msk [vmem:[%s1045_s3 + $0x6c] sm:$0xf] %vm582_vm3, %v712_v19  ;;  %v344_v28 = vadd.f32 %v879_v21, %v343_v62  ;;  %v291_v29 = vadd.f32 %v751_v3, %v879_v21  ;;  %vm388_vm14 = vcmp.gt.f32.partialorder %v352_v25, 0.0 }
  0xff   :  { %v710_v26 = vpack.c.bf16 %v447_v23, %v447_v23  ;;  %592 = vst.msk [vmem:[%s1045_s3 + $0x24] sm:$0xf] %vm582_vm3, %v694_v22  ;;  %v436_v30 = vsel %vm372_vm13, %v288_v2, %v404_v24  ;;  %v420_v31 = vmul.f32 0.0, %v352_v25  ;;  %v355_v32 = vadd.f32 %v767_v4, %v879_v21 }
 0x100   :  { %v699_v33 = vpack.c.bf16 %v436_v30, %v436_v30  ;;  %vm370_vm15 = vcmp.gt.f32.partialorder %v280_v27, 0.0  ;;  %v402_v34 = vmul.f32 0.0, %v280_v27  ;;  %vm386_vm0 = vcmp.gt.f32.partialorder %v344_v28, 0.0 }
 0x101   :  { %608 = vst.msk [vmem:[%s1045_s3 + $0x64] sm:$0xf] %vm582_vm3, %v710_v26  ;;  %v452_v35 = vsel %vm388_vm14, %v352_v25, %v420_v31  ;;  %v418_v36 = vmul.f32 0.0, %v344_v28  ;;  %vm373_vm1 = vcmp.gt.f32.partialorder %v291_v29, 0.0  ;;  %v405_v37 = vmul.f32 0.0, %v291_v29 }
 0x102   :  { %597 = vst.msk [vmem:[%s1045_s3 + $0x38] sm:$0xf] %vm582_vm3, %v699_v33  ;;  %v715_v38 = vpack.c.bf16 %v452_v35, %v452_v35  ;;  %v434_v39 = vsel %vm370_vm15, %v280_v27, %v402_v34  ;;  %vm389_vm2 = vcmp.gt.f32.partialorder %v355_v32, 0.0  ;;  %v421_v40 = vmul.f32 0.0, %v355_v32 }
 0x103   :  { %v697_v41 = vpack.c.bf16 %v434_v39, %v434_v39  ;;  %v450_v42 = vsel %vm386_vm0, %v344_v28, %v418_v36  ;;  %v437_v43 = vsel %vm373_vm1, %v291_v29, %v405_v37  ;;  %v283_v44 = vadd.f32 %v879_v21, %v282_v8 }
 0x104   :  { %613 = vst.msk [vmem:[%s1045_s3 + $0x78] sm:$0xf] %vm582_vm3, %v715_v38  ;;  %v713_v45 = vpack.c.bf16 %v450_v42, %v450_v42  ;;  %v700_v46 = vpack.c.bf16 %v437_v43, %v437_v43  ;;  %v453_v47 = vsel %vm389_vm2, %v355_v32, %v421_v40  ;;  %v347_v48 = vadd.f32 %v879_v21, %v346_v9 }
 0x105   :  { %595 = vst.msk [vmem:[%s1045_s3 + $0x30] sm:$0xf] %vm582_vm3, %v697_v41  ;;  %v716_v49 = vpack.c.bf16 %v453_v47, %v453_v47  ;;  %vm371_vm4 = vcmp.gt.f32.partialorder %v283_v44, 0.0  ;;  %v403_v50 = vmul.f32 0.0, %v283_v44 }
 0x106   :  { %611 = vst.msk [vmem:[%s1045_s3 + $0x70] sm:$0xf] %vm582_vm3, %v713_v45  ;;  %598 = vst.msk [vmem:[%s1045_s3 + $0x3c] sm:$0xf] %vm582_vm3, %v700_v46  ;;  %vm387_vm5 = vcmp.gt.f32.partialorder %v347_v48, 0.0  ;;  %v419_v21 = vmul.f32 0.0, %v347_v48 }
 0x107   :  { %614 = vst.msk [vmem:[%s1045_s3 + $0x7c] sm:$0xf] %vm582_vm3, %v716_v49  ;;  %v435_v51 = vsel %vm371_vm4, %v283_v44, %v403_v50 }
 0x108   :  { %v698_v52 = vpack.c.bf16 %v435_v51, %v435_v51  ;;  %v451_v53 = vsel %vm387_vm5, %v347_v48, %v419_v21 }
 0x109   :  { %v714_v54 = vpack.c.bf16 %v451_v53, %v451_v53 }
 0x10a   :  { %596 = vst.msk [vmem:[%s1045_s3 + $0x34] sm:$0xf] %vm582_vm3, %v698_v52 }
 0x10b   :  { %612 = vst.msk [vmem:[%s1045_s3 + $0x74] sm:$0xf] %vm582_vm3, %v714_v54 }

</bundles_post_ra>
